<compile_context>
chip_gen: v6e
topology: v6e:2x2x1
jax: 0.10.0
libtpu: 0.0.40
codegen_flags: <defaults>
</compile_context>

<pallas_src>
import jax
import jax.numpy as jnp
from jax.experimental import pallas as pl
from jax.experimental.pallas import tpu as pltpu


def _add_pos_kernel(x_ref, pos_ref, o_ref):
    # x_ref / o_ref: (TR, TC) row-block of the flattened (b, n*d) view.
    # pos_ref:       (1, TC)  positional slab; broadcasts over the sublane (row) dim.
    o_ref[...] = x_ref[...] + pos_ref[...]


def _largest_divisor_multiple(total, unit, cap):
    """Largest multiple of `unit` that divides `total` and is <= cap (0 if none)."""
    best = 0
    cand = unit
    limit = min(cap, total)
    while cand <= limit:
        if total % cand == 0:
            best = cand
        cand += unit
    return best


def _round_up(v, m):
    return ((v + m - 1) // m) * m


def _vmem_capacity_bytes():
    """Best-effort VMEM capacity query; falls back to the smallest (v7x) value."""
    try:
        info = pltpu.get_tpu_info()
        for attr in ("vmem_capacity_bytes", "vmem_bytes", "vmem_size_bytes"):
            v = getattr(info, attr, None)
            if isinstance(v, int) and v > 0:
                return v
    except Exception:
        pass
    return 64 * 1024 * 1024  # conservative default == v7x per-TC VMEM


def learnable_encoder_forward(x, positional, *, force_pallas=False):
    """x: (b, n, d) array; positional: (input_dim, d) array with input_dim >= n."""
    b, n, d = x.shape
    input_dim, d_p = positional.shape
    assert d_p == d and input_dim >= n

    itemsize = jnp.dtype(x.dtype).itemsize
    total_bytes = b * n * d * itemsize

    # --- small-shape bypass: launch overhead dominates; XLA's fused add wins ---
    if not force_pallas and total_bytes < 256 * 1024:
        return x + positional[None, :n, :].astype(x.dtype)

    # --- layout plumbing (cheap slice + contiguous reshapes, no compute) ---
    cols = n * d
    x2 = x.reshape(b, cols)
    pos2 = positional[:n, :].astype(x.dtype).reshape(1, cols)

    sublane = max(8, (32 // (itemsize * 8)) * 8)  # 8 for f32, 16 for bf16, 32 for int8

    # --- per-generation VMEM policy ---
    vmem_cap = _vmem_capacity_bytes()
    if vmem_cap >= 100 * 1024 * 1024:            # v5e / v6e (128 MiB VMEM)
        block_budget_bytes = 8 * 1024 * 1024
        vmem_limit = 64 * 1024 * 1024
    else:                                         # v7x (64 MiB VMEM) / unknown
        block_budget_bytes = 4 * 1024 * 1024
        vmem_limit = 32 * 1024 * 1024
    block_budget_elems = block_budget_bytes // itemsize

    # --- row tile (keep modest so columns stay long -> long DMA segments) ---
    row_cap = 256
    if b <= row_cap:
        tr = b                                   # full dim -> always a legal block
    else:
        tr = _largest_divisor_multiple(b, sublane, row_cap)
        if tr == 0:
            tr = row_cap                         # non-divisor; cdiv grid + masked tail
    grid_rows = pl.cdiv(b, tr)

    # --- column tile under the per-block budget ---
    max_tc = max(128, block_budget_elems // max(tr, 1))
    if cols <= max_tc:
        tc = cols                                # full dim -> legal regardless of % 128
    else:
        tc = _largest_divisor_multiple(cols, 128, max_tc)
        if tc == 0:
            tc = max(128, (max_tc // 128) * 128)  # 128-multiple; cdiv grid, masked tail
    grid_cols = pl.cdiv(cols, tc)

    # --- keep >= 2 parallel blocks for megacore (v7x: 2 TCs) on non-tiny shapes ---
    if grid_rows * grid_cols == 1 and total_bytes > (1 << 20):
        if cols >= 256:
            tc = max(128, _round_up((cols + 1) // 2, 128))
            grid_cols = pl.cdiv(cols, tc)
        elif b >= 2 * sublane:
            tr = max(sublane, _round_up((b + 1) // 2, sublane))
            grid_rows = pl.cdiv(b, tr)

    grid = (grid_cols, grid_rows)                # inner (fastest) axis = rows

    out2 = pl.pallas_call(
        _add_pos_kernel,
        out_shape=jax.ShapeDtypeStruct((b, cols), x.dtype),
        grid_spec=pltpu.PrefetchScalarGridSpec(
            num_scalar_prefetch=0,
            grid=grid,
            in_specs=[
                pl.BlockSpec((tr, tc), lambda j, i: (i, j)),
                # pos block index is constant across the inner (row) axis, so it
                # stays resident in VMEM instead of being re-DMA-ed per row block.
                pl.BlockSpec((1, tc), lambda j, i: (0, j)),
            ],
            out_specs=pl.BlockSpec((tr, tc), lambda j, i: (i, j)),
        ),
        compiler_params=pltpu.CompilerParams(
            dimension_semantics=("parallel", "parallel"),
            vmem_limit_bytes=vmem_limit,
        ),
    )(x2, pos2)

    return out2.reshape(b, n, d)


if __name__ == "__main__":
    # Small shapes consistent with the module:
    #   input_dim=16 (max sequence length the table supports), embed_dim=32
    #   batch=2, seq n=8 (n <= input_dim), feature dim must equal embed_dim
    input_dim, embed_dim = 16, 32
    b, n = 2, 8

    key = jax.random.PRNGKey(0)
    k_pos, k_x = jax.random.split(key)

    # Deterministic "randn" init of the learnable positional parameter.
    positional = jax.random.normal(k_pos, (input_dim, embed_dim), dtype=jnp.float32)
    x = jax.random.normal(k_x, (b, n, embed_dim), dtype=jnp.float32)

    # Force the Pallas path so the kernel itself is exercised at demo sizes.
    out = learnable_encoder_forward(x, positional, force_pallas=True)
    out = jax.block_until_ready(out)

    ref = x + positional[None, :n, :]
    assert out.shape == (b, n, embed_dim)
    assert jnp.allclose(out, ref, atol=1e-6), "mismatch vs reference"

    # Odd sequence length exercises the positional-table slice (n=7 < input_dim).
    x7 = jax.random.normal(jax.random.PRNGKey(1), (b, 7, embed_dim), dtype=jnp.float32)
    out7 = jax.block_until_ready(
        learnable_encoder_forward(x7, positional, force_pallas=True))
    assert jnp.allclose(out7, x7 + positional[None, :7, :], atol=1e-6), "mismatch (n=7)"

    # Small-shape bypass path (no Pallas) keeps identical semantics.
    out_bypass = jax.block_until_ready(learnable_encoder_forward(x, positional))
    assert jnp.allclose(out_bypass, ref, atol=1e-6), "mismatch (bypass)"

    print("KERNEL_OK")
</pallas_src>

<mosaic_0001>
module attributes {stable_mosaic.version = 11 : i64} {
  func.func @_add_pos_kernel(%arg0: i32, %arg1: i32, %arg2: memref<2x256xf32, #tpu.memory_space<vmem>>, %arg3: memref<1x256xf32, #tpu.memory_space<vmem>>, %arg4: memref<2x256xf32, #tpu.memory_space<vmem>>) attributes {dimension_semantics = [#tpu.dimension_semantics<parallel>, #tpu.dimension_semantics<parallel>], iteration_bounds = array<i64: 1, 1>, scalar_prefetch = 0 : i64, scratch_operands = 0 : i64, tpu.core_type = #tpu.core_type<tc>, window_params = [{transform_indices = @transform_0, window_bounds = array<i64: 2, 256>}, {transform_indices = @transform_1, window_bounds = array<i64: 1, 256>}, {transform_indices = @transform_2, window_bounds = array<i64: 2, 256>}]} {
    %c0 = arith.constant 0 : index
    %c0_0 = arith.constant 0 : index
    %0 = vector.load %arg2[%c0, %c0_0] : memref<2x256xf32, #tpu.memory_space<vmem>>, vector<2x256xf32>
    %c0_1 = arith.constant 0 : index
    %c0_2 = arith.constant 0 : index
    %1 = vector.load %arg3[%c0_1, %c0_2] : memref<1x256xf32, #tpu.memory_space<vmem>>, vector<1x256xf32>
    %2 = vector.broadcast %1 : vector<1x256xf32> to vector<2x256xf32>
    %3 = arith.addf %0, %2 : vector<2x256xf32>
    %c0_3 = arith.constant 0 : index
    %c0_4 = arith.constant 0 : index
    %4 = vector.load %arg4[%c0_3, %c0_4] : memref<2x256xf32, #tpu.memory_space<vmem>>, vector<2x256xf32>
    tpu.vector_store %arg4[%c0_3, %c0_4], %3 {strides = array<i32>} : memref<2x256xf32, #tpu.memory_space<vmem>>, vector<2x256xf32>,
    return
  }
  func.func @transform_0(%arg0: i32, %arg1: i32) -> (i32, i32) {
    %c0_i32 = arith.constant 0 : i32
    return %arg1, %arg0 : i32, i32
  }
  func.func @transform_1(%arg0: i32, %arg1: i32) -> (i32, i32) {
    %c0_i32 = arith.constant 0 : i32
    %c0_i32_0 = arith.constant 0 : i32
    return %c0_i32, %arg0 : i32, i32
  }
  func.func @transform_2(%arg0: i32, %arg1: i32) -> (i32, i32) {
    %c0_i32 = arith.constant 0 : i32
    return %arg1, %arg0 : i32, i32
  }
}

</mosaic_0001>

<bundles_post_ra>
// kernel: tpu_custom_call.1
= control target key start
LH: loop header
LB: loop body
LE: loop exit
PB: predicated region body
PF: predicated region fallthrough
CT: control target
= control target key end

     0   :  { %7 = vsyncpa [#allocation3], 0  ;;  %s172_s0 = inlined_call_operand.hbm [shape: f32[2,256], index: 0, kind: input, shape index: {}]   ;;  %s173_s1 = inlined_call_operand.hbm [shape: f32[1,256], index: 1, kind: input, shape index: {}]   ;;  %s174_s2 = inlined_call_operand.hbm [shape: f32[2,256], index: 2, kind: output, shape index: {}]  }
   0x1   :  { %8 = vsyncpa [#allocation6], 0 }
   0x2   :  { %9 = vsyncpa [#allocation4], 0  ;;  %s144_s9 = smov [#allocation2]   ;;  %s145_s11 = smov [#allocation5]  }
   0x3   :  { %s16_s10 = sshll.u32 %s144_s9, 4  ;;  %s26_s12 = sshll.u32 %s145_s11, 4  ;;  %s17_s10 = int_to_ptr.vmem [resolvable:$true] %s16_s10  ;;  %s27_s12 = int_to_ptr.vmem [resolvable:$true] %s26_s12 }
   0x4   :  { %s86_s13 = scalar_lea.vmem %s17_s10, 64  ;;  %p91_p1 = scmp.lt.s32.totalorder %s17_s10, %s17_s10 }
   0x5   :  { %p87_p0 = scmp.ne.s32.totalorder %s17_s10, %s86_s13  ;;  %p92_p2 = scmp.lt.s32.totalorder %s86_s13, %s86_s13 }
   0x7   :  { %p93_p3 = por %p92_p2, %p91_p1 }
   0x9   :  { %p94_p4 = pnand %p93_p3, %p87_p0 }
   0xb   :  { %97 = shalt.err (!%p94_p4)
}
   0xc   :  { %19 = dma.hbm_to_vmem [thread:$0]  %s172_s0, 64, %s17_s10, [#allocation3]  }
   0xd   :  { %s106_s16 = scalar_lea.vmem %s27_s12, 32  ;;  %p111_p6 = scmp.lt.s32.totalorder %s27_s12, %s27_s12 }
   0xe   :  { %p107_p5 = scmp.ne.s32.totalorder %s27_s12, %s106_s16  ;;  %p112_p7 = scmp.lt.s32.totalorder %s106_s16, %s106_s16 }
  0x10   :  { %p113_p8 = por %p112_p7, %p111_p6 }
  0x12   :  { %p114_p9 = pnand %p113_p8, %p107_p5 }
  0x14   :  { %117 = shalt.err (!%p114_p9)
}
  0x15   :  { %29 = dma.hbm_to_vmem [thread:$0]  %s173_s1, 32, %s27_s12, [#allocation6]  }
  0x16   :  { %138 = dma.done.wait [#allocation3], 64  }
  0x17   :  { %139 = vsyncadd [#allocation3], 4294967232 }
  0x18   :  { %140 = dma.done.wait [#allocation6], 32  }
  0x19   :  { %141 = vsyncadd [#allocation6], 4294967264  ;;  %v39_v0 = vlaneseq  ;;  %v146_v1 = vmov 1983009808   ;;  %v37_v7 = vld [vmem:[#allocation5] sm:$0x3] }
  0x1a   :  { %v49_v2 = vunpack.c.l.s4 %v146_v1  ;;  %v36_v12 = vld [vmem:[#allocation2] sm:$0xf]  ;;  %s147_s0 = smov [#allocation7]  }
  0x1b   :  { %v40_v3 = vshrl.u32 %v39_v0, 7  ;;  %s64_s19 = sshll.u32 %s147_s0, 4  ;;  %s65_s19 = int_to_ptr.vmem [resolvable:$true] %s64_s19 }
  0x1c   :  { %v50_v6 = vunpack.c.0.s8 %v49_v2  ;;  %s118_s1 = scalar_lea.vmem %s65_s19, 64  ;;  %p123_p11 = scmp.lt.s32.totalorder %s65_s19, %s65_s19 }
  0x1d   :  { %v41_v4 = vsub.s32 0, %v40_v3  ;;  %v45_v5 = vsub.s32 1, %v40_v3  ;;  %p119_p10 = scmp.ne.s32.totalorder %s65_s19, %s118_s1  ;;  %p124_p12 = scmp.lt.s32.totalorder %s118_s1, %s118_s1 }
  0x1e   :  { %v53_v10 = vsub.s32 %v50_v6, %v40_v3 }
  0x1f   :  { %v42_v8 = vrot.slane %v37_v7, %v41_v4  ;;  %v46_v9 = vrot.slane %v37_v7, %v45_v5  ;;  %p125_p13 = por %p124_p12, %p123_p11 }
  0x21   :  { %v47_v11 = vcombine.low %v42_v8, %v46_v9  ;;  %p126_p0 = pnand %p125_p13, %p119_p10 }
  0x23   :  { %v54_v13 = vrot.slane %v47_v11, %v53_v10 }
  0x25   :  { %v56_v14 = vadd.f32 %v54_v13, %v36_v12 }
  0x27   :  { %57 = vst [vmem:[#allocation7] sm:$0xf] %v56_v14 }
  0x28   :  { %129 = shalt.err (!%p126_p0)
}
  0x29   :  { %67 = dma.vmem_to_hbm [thread:$0]  %s65_s19, 64, %s174_s2, [#allocation4]  }
  0x2a   :  { %142 = dma.done.wait [#allocation4], 64  }
  0x2b   :  { %143 = vsyncadd [#allocation4], 4294967232 }
  0x2c   :  { %71 = vsyncpa [#allocation3], 1 }
  0x2d   :  { %72 = vsyncpa [#allocation6], 1 }
  0x2e   :  { %73 = vsyncpa [#allocation4], 1 }

</bundles_post_ra>
